<compile_context>
chip_gen: v7x
topology: tpu7x:2x2x1
jax: 0.10.0
libtpu: 0.0.40
codegen_flags: <defaults>
</compile_context>

<pallas_src>
import functools

import jax
import jax.numpy as jnp
from jax.experimental import pallas as pl
from jax.experimental.pallas import tpu as pltpu


def _mtu_loss_kernel(loss_ref, logvar_ref, flag_ref, out_ref):
    # loss_ref:   (T, TILE_N) f32 VMEM block
    # logvar_ref: (T, 1)      f32 (per-task learnable log-variance)
    # flag_ref:   (T, 1)      f32 (1.0 => regression task)
    # out_ref:    (1, TILE_N) f32 (sum over tasks)
    lv = logvar_ref[...]                                  # (T, 1)
    flag = flag_ref[...]                                  # (T, 1)

    # coeff = 1/(2*stds^2) or 1/stds^2  ==  scale * exp(-log_var)
    scale = jnp.where(flag > 0.5, 0.5, 1.0)               # (T, 1)
    coeff = scale * jnp.exp(-lv)                          # (T, 1)
    const = 0.5 * lv                                      # (T, 1) == log(stds)

    # Statically unrolled accumulation over the (small, static) task axis:
    # stays on the VALU instead of a cross-sublane XLU reduction.
    t = loss_ref.shape[0]
    acc = coeff[0:1, :] * loss_ref[pl.ds(0, 1), :] + const[0:1, :]
    for i in range(1, t):
        acc = acc + coeff[i:i + 1, :] * loss_ref[pl.ds(i, 1), :] + const[i:i + 1, :]
    out_ref[...] = acc


@functools.partial(jax.jit, static_argnames=("tile_n",))
def _mtu_loss_call(loss_values, logvar, flags, *, tile_n):
    T, n_pad = loss_values.shape
    grid = (n_pad // tile_n,)
    return pl.pallas_call(
        _mtu_loss_kernel,
        out_shape=jax.ShapeDtypeStruct((1, n_pad), jnp.float32),
        grid_spec=pltpu.PrefetchScalarGridSpec(
            num_scalar_prefetch=0,
            grid=grid,
            in_specs=[
                pl.BlockSpec((T, tile_n), lambda i: (0, i)),
                pl.BlockSpec((T, 1), lambda i: (0, 0)),
                pl.BlockSpec((T, 1), lambda i: (0, 0)),
            ],
            out_specs=pl.BlockSpec((1, tile_n), lambda i: (0, i)),
        ),
        compiler_params=pltpu.CompilerParams(
            dimension_semantics=("parallel",)),
    )(loss_values, logvar, flags)


def multitask_uncertainty_loss(loss_values, log_var_tasks, regg_flag,
                               *, tile_n=2048):
    """loss_values: (T, N) f32; log_var_tasks: (T,) f32; regg_flag: (T,) bool-like.

    Returns the (N,) total loss (same shape as each per-task loss vector).
    """
    loss_values = jnp.asarray(loss_values, jnp.float32)
    T, N = loss_values.shape
    logvar = jnp.asarray(log_var_tasks, jnp.float32).reshape(T, 1)
    flags = jnp.asarray(regg_flag, jnp.float32).reshape(T, 1)

    # Lane-dense tiling: tile width is a multiple of 128; pad N (with zeros,
    # discarded after) so the tile divides the padded extent evenly.
    n128 = ((N + 127) // 128) * 128
    tile_n = min(tile_n, n128)
    n_pad = ((N + tile_n - 1) // tile_n) * tile_n
    if n_pad != N:
        loss_values = jnp.pad(loss_values, ((0, 0), (0, n_pad - N)))

    out = _mtu_loss_call(loss_values, logvar, flags, tile_n=tile_n)
    return out[0, :N]


def _reference(loss_values, log_var_tasks, regg_flag):
    # Direct transcription of the PyTorch module.
    total = 0.0
    for i in range(loss_values.shape[0]):
        stds = jnp.exp(log_var_tasks[i]) ** 0.5
        coeff = 1.0 / (2.0 * stds ** 2) if regg_flag[i] else 1.0 / stds ** 2
        total = total + coeff * loss_values[i] + jnp.log(stds)
    return total


if __name__ == "__main__":
    key = jax.random.PRNGKey(0)

    # Case 1: small demo shape (3 tasks, 8 per-task loss elements).
    T1, N1 = 3, 8
    k1, k2, k3, k4 = jax.random.split(key, 4)
    log_var_1 = jax.random.normal(k1, (T1,), dtype=jnp.float32) * 0.5
    loss_1 = jax.random.uniform(k2, (T1, N1), dtype=jnp.float32,
                                minval=0.1, maxval=2.0)
    flags_1 = [True, False, True]

    out_1 = multitask_uncertainty_loss(loss_1, log_var_1, flags_1)
    out_1 = jax.block_until_ready(out_1)
    ref_1 = _reference(loss_1, log_var_1, flags_1)
    assert out_1.shape == (N1,)
    assert jnp.allclose(out_1, ref_1, rtol=1e-5, atol=1e-5), (out_1, ref_1)

    # Case 2: ragged N with a multi-step parallel grid (exercises padding +
    # tiling + slice-back).
    T2, N2 = 4, 300
    log_var_2 = jax.random.normal(k3, (T2,), dtype=jnp.float32) * 0.5
    loss_2 = jax.random.uniform(k4, (T2, N2), dtype=jnp.float32,
                                minval=0.1, maxval=2.0)
    flags_2 = [True, False, False, True]

    out_2 = multitask_uncertainty_loss(loss_2, log_var_2, flags_2, tile_n=128)
    out_2 = jax.block_until_ready(out_2)
    ref_2 = _reference(loss_2, log_var_2, flags_2)
    assert out_2.shape == (N2,)
    assert jnp.allclose(out_2, ref_2, rtol=1e-5, atol=1e-5), (out_2, ref_2)

    print("KERNEL_OK")
</pallas_src>

<mosaic_0001>
module attributes {stable_mosaic.version = 11 : i64} {
  func.func @_mtu_loss_kernel(%arg0: i32, %arg1: memref<3x128xf32, #tpu.memory_space<vmem>>, %arg2: memref<3x1xf32, #tpu.memory_space<vmem>>, %arg3: memref<3x1xf32, #tpu.memory_space<vmem>>, %arg4: memref<1x128xf32, #tpu.memory_space<vmem>>) attributes {dimension_semantics = [#tpu.dimension_semantics<parallel>], iteration_bounds = array<i64: 1>, scalar_prefetch = 0 : i64, scratch_operands = 0 : i64, tpu.core_type = #tpu.core_type<tc>, window_params = [{transform_indices = @transform_0, window_bounds = array<i64: 3, 128>}, {pipeline_mode = #tpu.pipeline_mode<synchronous>, transform_indices = @transform_1, window_bounds = array<i64: 3, 1>}, {pipeline_mode = #tpu.pipeline_mode<synchronous>, transform_indices = @transform_2, window_bounds = array<i64: 3, 1>}, {transform_indices = @transform_3, window_bounds = array<i64: 1, 128>}]} {
    %c0 = arith.constant 0 : index
    %c0_0 = arith.constant 0 : index
    %0 = vector.load %arg2[%c0, %c0_0] : memref<3x1xf32, #tpu.memory_space<vmem>>, vector<3x1xf32>
    %c0_1 = arith.constant 0 : index
    %c0_2 = arith.constant 0 : index
    %1 = vector.load %arg3[%c0_1, %c0_2] : memref<3x1xf32, #tpu.memory_space<vmem>>, vector<3x1xf32>
    %cst = arith.constant 5.000000e-01 : f32
    %2 = vector.broadcast %cst : f32 to vector<3x1xf32>
    %3 = arith.cmpf ogt, %1, %2 : vector<3x1xf32>
    %cst_3 = arith.constant 5.000000e-01 : f32
    %cst_4 = arith.constant 1.000000e+00 : f32
    %4 = vector.broadcast %cst_3 : f32 to vector<3x1xf32>
    %5 = vector.broadcast %cst_4 : f32 to vector<3x1xf32>
    %6 = arith.select %3, %4, %5 : vector<3x1xi1>, vector<3x1xf32>
    %cst_5 = arith.constant 0.000000e+00 : f32
    %7 = vector.broadcast %cst_5 : f32 to vector<3x1xf32>
    %8 = arith.subf %7, %0 : vector<3x1xf32>
    %9 = math.exp %8 : vector<3x1xf32>
    %10 = arith.mulf %6, %9 : vector<3x1xf32>
    %cst_6 = arith.constant 5.000000e-01 : f32
    %11 = vector.broadcast %cst_6 : f32 to vector<3x1xf32>
    %12 = arith.mulf %11, %0 : vector<3x1xf32>
    %13 = vector.extract_strided_slice %10 {offsets = [0, 0], sizes = [1, 1], strides = [1, 1]} : vector<3x1xf32> to vector<1x1xf32>
    %c0_7 = arith.constant 0 : index
    %c0_8 = arith.constant 0 : index
    %14 = vector.load %arg1[%c0_7, %c0_8] : memref<3x128xf32, #tpu.memory_space<vmem>>, vector<1x128xf32>
    %15 = vector.broadcast %13 : vector<1x1xf32> to vector<1x128xf32>
    %16 = arith.mulf %15, %14 : vector<1x128xf32>
    %17 = vector.extract_strided_slice %12 {offsets = [0, 0], sizes = [1, 1], strides = [1, 1]} : vector<3x1xf32> to vector<1x1xf32>
    %18 = vector.broadcast %17 : vector<1x1xf32> to vector<1x128xf32>
    %19 = arith.addf %16, %18 : vector<1x128xf32>
    %20 = vector.extract_strided_slice %10 {offsets = [1, 0], sizes = [1, 1], strides = [1, 1]} : vector<3x1xf32> to vector<1x1xf32>
    %c1 = arith.constant 1 : index
    %c0_9 = arith.constant 0 : index
    %21 = vector.load %arg1[%c1, %c0_9] : memref<3x128xf32, #tpu.memory_space<vmem>>, vector<1x128xf32>
    %22 = vector.broadcast %20 : vector<1x1xf32> to vector<1x128xf32>
    %23 = arith.mulf %22, %21 : vector<1x128xf32>
    %24 = arith.addf %19, %23 : vector<1x128xf32>
    %25 = vector.extract_strided_slice %12 {offsets = [1, 0], sizes = [1, 1], strides = [1, 1]} : vector<3x1xf32> to vector<1x1xf32>
    %26 = vector.broadcast %25 : vector<1x1xf32> to vector<1x128xf32>
    %27 = arith.addf %24, %26 : vector<1x128xf32>
    %28 = vector.extract_strided_slice %10 {offsets = [2, 0], sizes = [1, 1], strides = [1, 1]} : vector<3x1xf32> to vector<1x1xf32>
    %c2 = arith.constant 2 : index
    %c0_10 = arith.constant 0 : index
    %29 = vector.load %arg1[%c2, %c0_10] : memref<3x128xf32, #tpu.memory_space<vmem>>, vector<1x128xf32>
    %30 = vector.broadcast %28 : vector<1x1xf32> to vector<1x128xf32>
    %31 = arith.mulf %30, %29 : vector<1x128xf32>
    %32 = arith.addf %27, %31 : vector<1x128xf32>
    %33 = vector.extract_strided_slice %12 {offsets = [2, 0], sizes = [1, 1], strides = [1, 1]} : vector<3x1xf32> to vector<1x1xf32>
    %34 = vector.broadcast %33 : vector<1x1xf32> to vector<1x128xf32>
    %35 = arith.addf %32, %34 : vector<1x128xf32>
    %c0_11 = arith.constant 0 : index
    %c0_12 = arith.constant 0 : index
    %36 = vector.load %arg4[%c0_11, %c0_12] : memref<1x128xf32, #tpu.memory_space<vmem>>, vector<1x128xf32>
    tpu.vector_store %arg4[%c0_11, %c0_12], %35 {strides = array<i32>} : memref<1x128xf32, #tpu.memory_space<vmem>>, vector<1x128xf32>,
    return
  }
  func.func @transform_0(%arg0: i32) -> (i32, i32) {
    %c0_i32 = arith.constant 0 : i32
    %c0_i32_0 = arith.constant 0 : i32
    return %c0_i32, %arg0 : i32, i32
  }
  func.func @transform_1(%arg0: i32) -> (i32, i32) {
    %c0_i32 = arith.constant 0 : i32
    %c0_i32_0 = arith.constant 0 : i32
    %c0_i32_1 = arith.constant 0 : i32
    return %c0_i32, %c0_i32_0 : i32, i32
  }
  func.func @transform_2(%arg0: i32) -> (i32, i32) {
    %c0_i32 = arith.constant 0 : i32
    %c0_i32_0 = arith.constant 0 : i32
    %c0_i32_1 = arith.constant 0 : i32
    return %c0_i32, %c0_i32_0 : i32, i32
  }
  func.func @transform_3(%arg0: i32) -> (i32, i32) {
    %c0_i32 = arith.constant 0 : i32
    %c0_i32_0 = arith.constant 0 : i32
    return %c0_i32, %arg0 : i32, i32
  }
}

</mosaic_0001>

<bundles_post_ra>
// kernel: _mtu_loss_call.1
= control target key start
LH: loop header
LB: loop body
LE: loop exit
PB: predicated region body
PF: predicated region fallthrough
CT: control target
= control target key end

     0   :  { %v106_v1 = vmov 0   ;;  %s156_s0 = inlined_call_operand.vmem [shape: f32[3,128], index: 0, kind: input, shape index: {}]   ;;  %s157_s1 = inlined_call_operand.vmem [shape: f32[3,1], index: 1, kind: input, shape index: {}]   ;;  %s158_s2 = inlined_call_operand.vmem [shape: f32[3,1], index: 2, kind: input, shape index: {}]   ;;  %s159_s3 = inlined_call_operand.hbm [shape: f32[1,128], index: 3, kind: output, shape index: {}]  }
   0x1   :  { %v15_v0 = vld [vmem:[%s157_s1] sm:$0x7]  ;;  %79 = vset.pattern.permute.xlu0 %v106_v1 }
   0x2   :  { %v19_v2 = vsub.f32 0.0, %v15_v0 }
   0x4   :  { %v20_v3 = vmul.f32 1.442695, %v19_v2 }
   0x5   :  { %8 = vsyncpa [#allocation3], 0  ;;  %v16_v4 = vld [vmem:[%s158_s2] sm:$0x7]  ;;  %v107_v5 = vmov 1.0   ;;  %v23_v9 = vmul.f32 0.5, %v15_v0 }
   0x6   :  { %80 = vpow2.f32 %v20_v3  ;;  %vm17_vm0 = vcmp.gt.f32.partialorder %v16_v4, 0.5  ;;  %v37_v10 = vld [vmem:[%s156_s0 + $0x1] sm:$0x1]  ;;  %v49_v12 = vld [vmem:[%s156_s0 + $0x2] sm:$0x1]  ;;  %s108_s2 = smov [#allocation2]  }
   0x7   :  { %v18_v6 = vsel %vm17_vm0, 0.5, %v107_v5  ;;  %v39_v11 = vrot.slane %v37_v10, 7  ;;  %v24_v13 = vld [vmem:[%s156_s0] sm:$0x1]  ;;  %v51_v15 = vrot.slane %v49_v12, 6  ;;  %s68_s21 = sshll.u32 %s108_s2, 4  ;;  %s69_s21 = int_to_ptr.vmem [resolvable:$true] %s68_s21 }
   0x8   :  { %s82_s0 = scalar_lea.vmem %s69_s21, 16  ;;  %s86_s22 = scalar_lea.vmem %s69_s21, 32 }
   0x9   :  { %p83_p0 = scmp.ne.s32.totalorder %s69_s21, %s82_s0  ;;  %p87_p1 = scmp.lt.s32.totalorder %s69_s21, %s69_s21 }
   0xa   :  { %p88_p2 = scmp.lt.s32.totalorder %s86_s22, %s82_s0 }
   0xc   :  { %p89_p3 = por %p88_p2, %p87_p1 }
   0xe   :  { %p90_p4 = pnand %p89_p3, %p83_p0 }
  0x10   :  { %v81_v7 = vpop.eup %80 }
  0x11   :  { %v22_v8 = vmul.f32 %v81_v7, %v18_v6 }
  0x13   :  { %27 = vperm.xlu0 %79, %v22_v8  }
  0x17   :  { %33 = vperm.xlu0 %79, %v23_v9  }
  0x92   :  { %v28_v14 = vpop.permute.xlu0 %27 }
  0x93   :  { %v41_v16 = vmul.f32 %v39_v11, %v28_v14  ;;  %v30_v17 = vmul.f32 %v28_v14, %v24_v13  ;;  %v53_v20 = vmul.f32 %v51_v15, %v28_v14 }
  0x95   :  { %v43_v19 = vrot.slane %v41_v16, 1  ;;  %v55_v24 = vrot.slane %v53_v20, 2 }
  0x96   :  { %v34_v18 = vpop.permute.xlu0 %33 }
  0x97   :  { %v36_v21 = vadd.f32 %v34_v18, %v30_v17  ;;  %v46_v23 = vrot.slane %v34_v18, 1  ;;  %v58_v26 = vrot.slane %v34_v18, 2 }
  0x99   :  { %v45_v22 = vadd.f32 %v43_v19, %v36_v21 }
  0x9b   :  { %v48_v25 = vadd.f32 %v46_v23, %v45_v22 }
  0x9d   :  { %v57_v27 = vadd.f32 %v55_v24, %v48_v25 }
  0x9f   :  { %v60_v28 = vadd.f32 %v58_v26, %v57_v27 }
  0xa1   :  { %61 = vst [vmem:[#allocation2] sm:$0x1] %v60_v28 }
  0xa2   :  { %93 = shalt.err (!%p90_p4)
}
  0xa3   :  { %s94_s25 = scalar_lea.hbm %s159_s3, 16 }
  0xa4   :  { %p95_p5 = scmp.ne.s32.totalorder %s159_s3, %s94_s25  ;;  %p98_p6 = scmp.lt.u32.totalorder %s94_s25, %s159_s3 }
  0xa6   :  { %p100_p7 = pnand %p98_p6, %p95_p5 }
  0xa8   :  { %103 = shalt.err (!%p100_p7)
}
  0xa9   :  { %71 = dma.vmem_to_hbm [thread:$0]  %s69_s21, 16, %s159_s3, [#allocation3]  }
  0xaa   :  { %104 = dma.done.wait [#allocation3], 16  }
  0xab   :  { %105 = vsyncadd [#allocation3], 4294967280 }
  0xac   :  { %75 = vsyncpa [#allocation3], 1 }

</bundles_post_ra>
